<compile_context>
chip_gen: v5e
topology: v5e:2x2
jax: 0.10.0
libtpu: 0.0.40
codegen_flags: <defaults>
</compile_context>

<pallas_src>
import functools
import math

import jax
import jax.numpy as jnp
from jax import lax
from jax.experimental import pallas as pl
from jax.experimental.pallas import tpu as pltpu


# -----------------------------------------------------------------------------
# K-tiled linear kernel:  y = x @ w + b   (bf16 MXU inputs, f32 accumulation)
# -----------------------------------------------------------------------------
def _linear_acc_kernel(x_ref, w_ref, b_ref, o_ref, acc_ref):
    k = pl.program_id(0)

    @pl.when(k == 0)
    def _():
        acc_ref[...] = jnp.zeros_like(acc_ref)

    acc_ref[...] += jnp.dot(x_ref[...], w_ref[...],
                            preferred_element_type=jnp.float32)

    @pl.when(k == pl.num_programs(0) - 1)
    def _():
        o_ref[...] = (acc_ref[...] + b_ref[...]).astype(o_ref.dtype)


def linear_pallas(x, w, b):
    m, k_dim = x.shape
    n = w.shape[1]
    # Pick a K tile (multiple of 128 when possible) so that at real backbone
    # sizes the weight is streamed rather than kept fully VMEM-resident.
    bk = k_dim
    for cand in (512, 384, 256, 128):
        if k_dim % cand == 0:
            bk = cand
            break
    return pl.pallas_call(
        _linear_acc_kernel,
        out_shape=jax.ShapeDtypeStruct((m, n), jnp.float32),
        grid_spec=pltpu.PrefetchScalarGridSpec(
            num_scalar_prefetch=0,
            grid=(k_dim // bk,),
            in_specs=[
                pl.BlockSpec((m, bk), lambda k: (0, k)),
                pl.BlockSpec((bk, n), lambda k: (k, 0)),
                pl.BlockSpec((1, n), lambda k: (0, 0)),
            ],
            out_specs=pl.BlockSpec((m, n), lambda k: (0, 0)),
            scratch_shapes=[pltpu.VMEM((m, n), jnp.float32)],
        ),
        compiler_params=pltpu.CompilerParams(
            dimension_semantics=("arbitrary",)),   # K is a reduction axis
    )(x.astype(jnp.bfloat16), w.astype(jnp.bfloat16), b.reshape(1, -1))


# -----------------------------------------------------------------------------
# Fused temporal head: 2 x bidirectional LSTM layers + regressor, one kernel.
# -----------------------------------------------------------------------------
def _temporal_head_kernel(feat_ref,
                          wih0_ref, b0_ref, whh0_ref,
                          wih1_ref, b1_ref, whh1_ref,
                          wreg_ref, breg_ref,
                          out_ref,
                          xg_scr, h_scr,
                          *, n_batch, length, hidden):
    n_b, seq, hid = n_batch, length, hidden
    h2, h4, h8 = 2 * hid, 4 * hid, 8 * hid

    def input_proj(get_row, wih_ref, b_ref):
        # Hoisted gate projection: one (L, D) @ (D, 8H) bf16 matmul per batch
        # element covers all timesteps and BOTH directions; bias folded here
        # so the recurrence only computes h_prev @ W_hh.
        bias = b_ref[...]                                   # (1, 8H)
        for n in range(n_b):
            xg_scr[n] = (
                jnp.dot(get_row(n).astype(jnp.bfloat16), wih_ref[...],
                        preferred_element_type=jnp.float32) + bias)

    def cell(gates, c_prev):
        # PyTorch gate order i | f | g | o; hid is a multiple of 128 so every
        # slice below is lane-aligned (no sub-vreg shuffles).
        i = jax.nn.sigmoid(gates[:, 0:hid])
        f = jax.nn.sigmoid(gates[:, hid:2 * hid])
        g = jnp.tanh(gates[:, 2 * hid:3 * hid])
        o = jax.nn.sigmoid(gates[:, 3 * hid:4 * hid])
        c_new = f * c_prev + i * g
        h_new = o * jnp.tanh(c_new)
        return h_new, c_new

    def run_layer(whh_ref):
        # Fused fwd+rev recurrence: a single (N, 2H) @ (2H, 8H) bf16 matmul
        # per step against the block-diagonal W_hh (both directions at once).
        h_cat = jnp.zeros((n_b, h2), jnp.float32)
        c_f = jnp.zeros((n_b, hid), jnp.float32)
        c_r = jnp.zeros((n_b, hid), jnp.float32)
        for s in range(seq):              # statically unrolled (seq is small)
            g_rec = jnp.dot(h_cat.astype(jnp.bfloat16), whh_ref[...],
                            preferred_element_type=jnp.float32)    # (N, 8H)
            sr = seq - 1 - s              # original time index, reverse dir
            g_f = xg_scr[:, s:s + 1, 0:h4][:, 0, :] + g_rec[:, 0:h4]
            g_r = xg_scr[:, sr:sr + 1, h4:h8][:, 0, :] + g_rec[:, h4:h8]
            h_f, c_f = cell(g_f, c_f)
            h_r, c_r = cell(g_r, c_r)
            h_scr[:, s:s + 1, 0:hid] = h_f.reshape(n_b, 1, hid)
            h_scr[:, sr:sr + 1, hid:h2] = h_r.reshape(n_b, 1, hid)
            h_cat = jnp.concatenate([h_f, h_r], axis=-1)

    # ---- LSTM layer 0 (input = spatial features) --------------------------
    feat = feat_ref[...]                                    # (N, L, E)
    input_proj(lambda n: feat[n], wih0_ref, b0_ref)
    run_layer(whh0_ref)

    # ---- LSTM layer 1 (input = layer-0 hidden states, stays in VMEM) ------
    h0 = h_scr[...]                                         # (N, L, 2H)
    input_proj(lambda n: h0[n], wih1_ref, b1_ref)
    run_layer(whh1_ref)

    # ---- regressor epilogue: Linear(2H -> output_dim) ---------------------
    wreg = wreg_ref[...]
    breg = breg_ref[...]
    for n in range(n_b):
        out_ref[n] = (jnp.dot(h_scr[n], wreg,
                              preferred_element_type=jnp.float32)
                      + breg).astype(out_ref.dtype)


def temporal_head_pallas(feat, fp, *, hidden_dim):
    n_b, seq, _ = feat.shape
    out_dim = fp["w_reg"].shape[1]
    kernel = functools.partial(_temporal_head_kernel,
                               n_batch=n_b, length=seq, hidden=hidden_dim)
    return pl.pallas_call(
        kernel,
        out_shape=jax.ShapeDtypeStruct((n_b, seq, out_dim), jnp.float32),
        in_specs=[pl.BlockSpec(memory_space=pltpu.MemorySpace.VMEM)] * 9,
        out_specs=pl.BlockSpec(memory_space=pltpu.MemorySpace.VMEM),
        scratch_shapes=[
            pltpu.VMEM((n_b, seq, 8 * hidden_dim), jnp.float32),  # gate proj
            pltpu.VMEM((n_b, seq, 2 * hidden_dim), jnp.float32),  # hidden seq
        ],
    )(feat,
      fp["wih0"], fp["b0"], fp["whh0"],
      fp["wih1"], fp["b1"], fp["whh1"],
      fp["w_reg"], fp["b_reg"])


# -----------------------------------------------------------------------------
# Full forward pass of my_2dlstm
# -----------------------------------------------------------------------------
def my_2dlstm_forward(x, fp, *, hidden_dim):
    n_b, seq, c, w, h = x.shape
    # x.view(-1, channel, width, height) -> spatial -> (N*L, E)
    feat = linear_pallas(x.reshape(n_b * seq, c * w * h),
                         fp["w_sp"], fp["b_sp"])             # (N*L, E)
    feat = feat.reshape(n_b, seq, -1)
    # temporal (2-layer biLSTM) + regressor, fused into one kernel
    return temporal_head_pallas(feat, fp, hidden_dim=hidden_dim)


# -----------------------------------------------------------------------------
# Parameter construction / fusion
# -----------------------------------------------------------------------------
def init_params(key, *, in_dim, embedding_dim, hidden_dim, output_dim):
    def u(k, shape, bound):
        return jax.random.uniform(k, shape, jnp.float32, -bound, bound)

    keys = jax.random.split(key, 8)
    kb = 1.0 / math.sqrt(hidden_dim)

    def lstm_dir(k, input_size):
        k1, k2, k3 = jax.random.split(k, 3)
        return (u(k1, (input_size, 4 * hidden_dim), kb),     # W_ih^T
                u(k2, (hidden_dim, 4 * hidden_dim), kb),     # W_hh^T
                u(k3, (4 * hidden_dim,), kb))                # b_ih + b_hh

    return {
        # spatial stand-in projection (see TODO at top)
        "w_sp": u(keys[0], (in_dim, embedding_dim), 1.0 / math.sqrt(in_dim)),
        "b_sp": u(keys[1], (embedding_dim,), 1.0 / math.sqrt(in_dim)),
        "l0_fwd": lstm_dir(keys[2], embedding_dim),
        "l0_rev": lstm_dir(keys[3], embedding_dim),
        "l1_fwd": lstm_dir(keys[4], 2 * hidden_dim),
        "l1_rev": lstm_dir(keys[5], 2 * hidden_dim),
        "w_reg": u(keys[6], (2 * hidden_dim, output_dim),
                   1.0 / math.sqrt(2 * hidden_dim)),
        "b_reg": u(keys[7], (output_dim,), 1.0 / math.sqrt(2 * hidden_dim)),
    }


def fuse_params(params, *, hidden_dim):
    """Kernel-ready weights: fwd|rev concatenated W_ih (bf16), block-diagonal
    W_hh (bf16, both directions in one matmul), summed & lane-shaped biases."""
    hid = hidden_dim

    def fuse_layer(pf, pr):
        wih = jnp.concatenate([pf[0], pr[0]], axis=1).astype(jnp.bfloat16)
        b = jnp.concatenate([pf[2], pr[2]], axis=0).reshape(1, -1)
        whh = jnp.zeros((2 * hid, 8 * hid), jnp.float32)
        whh = whh.at[0:hid, 0:4 * hid].set(pf[1])
        whh = whh.at[hid:2 * hid, 4 * hid:8 * hid].set(pr[1])
        return wih, b, whh.astype(jnp.bfloat16)

    wih0, b0, whh0 = fuse_layer(params["l0_fwd"], params["l0_rev"])
    wih1, b1, whh1 = fuse_layer(params["l1_fwd"], params["l1_rev"])
    return {
        "w_sp": params["w_sp"], "b_sp": params["b_sp"],
        "wih0": wih0, "b0": b0, "whh0": whh0,
        "wih1": wih1, "b1": b1, "whh1": whh1,
        "w_reg": params["w_reg"], "b_reg": params["b_reg"].reshape(1, -1),
    }


# -----------------------------------------------------------------------------
# Pure-JAX reference (lax.scan LSTM, matching bf16-matmul numerics).
# -----------------------------------------------------------------------------
def _ref_lstm_dir(x_lnd, wih_t, whh_t, b, reverse):
    L, N, D = x_lnd.shape
    H = whh_t.shape[0]
    xs = x_lnd[::-1] if reverse else x_lnd
    wih_b = wih_t.astype(jnp.bfloat16)
    whh_b = whh_t.astype(jnp.bfloat16)

    def step(carry, x_t):
        h, c = carry
        gates = (jnp.dot(x_t.astype(jnp.bfloat16), wih_b,
                         preferred_element_type=jnp.float32)
                 + jnp.dot(h.astype(jnp.bfloat16), whh_b,
                           preferred_element_type=jnp.float32)
                 + b)
        i = jax.nn.sigmoid(gates[:, :H])
        f = jax.nn.sigmoid(gates[:, H:2 * H])
        g = jnp.tanh(gates[:, 2 * H:3 * H])
        o = jax.nn.sigmoid(gates[:, 3 * H:])
        c = f * c + i * g
        h = o * jnp.tanh(c)
        return (h, c), h

    init = (jnp.zeros((N, H), jnp.float32), jnp.zeros((N, H), jnp.float32))
    _, hs = lax.scan(step, init, xs)
    return hs[::-1] if reverse else hs


def my_2dlstm_forward_ref(x, params):
    N, L, C, W, Hh = x.shape
    x_flat = x.reshape(N * L, C * W * Hh)
    feat = (jnp.dot(x_flat.astype(jnp.bfloat16),
                    params["w_sp"].astype(jnp.bfloat16),
                    preferred_element_type=jnp.float32) + params["b_sp"])
    feat = feat.reshape(N, L, -1)

    def layer(x_nld, pf, pr):
        x_lnd = jnp.transpose(x_nld, (1, 0, 2))
        hf = _ref_lstm_dir(x_lnd, *pf, reverse=False)
        hr = _ref_lstm_dir(x_lnd, *pr, reverse=True)
        return jnp.transpose(jnp.concatenate([hf, hr], -1), (1, 0, 2))

    h = layer(feat, params["l0_fwd"], params["l0_rev"])
    h = layer(h, params["l1_fwd"], params["l1_rev"])
    out = h.reshape(N * L, -1) @ params["w_reg"] + params["b_reg"]
    return out.reshape(N, L, -1)


if __name__ == "__main__":
    # x: (num_batches, length, channel, width, height); feature dims follow
    # the module defaults (embedding_dim=512, hidden_dim=256, output_dim=1),
    # which keep every gate slice and hidden-state store 128-lane aligned.
    N, L, C, W, Hh = 2, 8, 3, 16, 16
    embedding_dim, hidden_dim, output_dim = 512, 256, 1

    key = jax.random.PRNGKey(0)
    k_x, k_p = jax.random.split(key)
    x = jax.random.normal(k_x, (N, L, C, W, Hh), dtype=jnp.float32)
    params = init_params(k_p, in_dim=C * W * Hh, embedding_dim=embedding_dim,
                         hidden_dim=hidden_dim, output_dim=output_dim)
    fused = fuse_params(params, hidden_dim=hidden_dim)

    out = jax.block_until_ready(
        my_2dlstm_forward(x, fused, hidden_dim=hidden_dim))
    assert out.shape == (N, L, output_dim), out.shape

    ref = jax.block_until_ready(my_2dlstm_forward_ref(x, params))
    max_err = float(jnp.max(jnp.abs(out - ref)))
    print(f"max_abs_err_vs_ref={max_err:.3e}")
    assert max_err < 1e-1, max_err   # loose: bf16 MXU vs XLA accumulation order

    print("KERNEL_OK")
</pallas_src>

<mosaic_0001>
module attributes {stable_mosaic.version = 11 : i64} {
  func.func @_linear_acc_kernel(%arg0: i32, %arg1: memref<16x384xbf16, #tpu.memory_space<vmem>>, %arg2: memref<384x512xbf16, #tpu.memory_space<vmem>>, %arg3: memref<1x512xf32, #tpu.memory_space<vmem>>, %arg4: memref<16x512xf32, #tpu.memory_space<vmem>>, %arg5: memref<16x512xf32, #tpu.memory_space<vmem>>) attributes {dimension_semantics = [#tpu.dimension_semantics<arbitrary>], iteration_bounds = array<i64: 2>, scalar_prefetch = 0 : i64, scratch_operands = 1 : i64, tpu.core_type = #tpu.core_type<tc>, window_params = [{transform_indices = @transform_0, window_bounds = array<i64: 16, 384>}, {transform_indices = @transform_1, window_bounds = array<i64: 384, 512>}, {pipeline_mode = #tpu.pipeline_mode<synchronous>, transform_indices = @transform_2, window_bounds = array<i64: 1, 512>}, {pipeline_mode = #tpu.pipeline_mode<synchronous>, transform_indices = @transform_3, window_bounds = array<i64: 16, 512>}]} {
    %c0_i32 = arith.constant 0 : i32
    %0 = arith.cmpi eq, %arg0, %c0_i32 : i32
    %1 = arith.extui %0 : i1 to i32
    %c0_i32_0 = arith.constant 0 : i32
    %2 = arith.cmpi ne, %1, %c0_i32_0 : i32
    scf.if %2 {
      %cst_9 = arith.constant 0.000000e+00 : f32
      %12 = vector.broadcast %cst_9 : f32 to vector<16x512xf32>
      %c0_10 = arith.constant 0 : index
      %c0_11 = arith.constant 0 : index
      %13 = vector.load %arg5[%c0_10, %c0_11] : memref<16x512xf32, #tpu.memory_space<vmem>>, vector<16x512xf32>
      tpu.vector_store %arg5[%c0_10, %c0_11], %12 {strides = array<i32>} : memref<16x512xf32, #tpu.memory_space<vmem>>, vector<16x512xf32>,
    } else {
    }
    %c0 = arith.constant 0 : index
    %c0_1 = arith.constant 0 : index
    %3 = vector.load %arg5[%c0, %c0_1] : memref<16x512xf32, #tpu.memory_space<vmem>>, vector<16x512xf32>
    %c0_2 = arith.constant 0 : index
    %c0_3 = arith.constant 0 : index
    %4 = vector.load %arg1[%c0_2, %c0_3] : memref<16x384xbf16, #tpu.memory_space<vmem>>, vector<16x384xbf16>
    %c0_4 = arith.constant 0 : index
    %c0_5 = arith.constant 0 : index
    %5 = vector.load %arg2[%c0_4, %c0_5] : memref<384x512xbf16, #tpu.memory_space<vmem>>, vector<384x512xbf16>
    %cst = arith.constant dense<0.000000e+00> : vector<16x512xf32>
    %6 = tpu.matmul %4, %5, %cst {dimension_numbers = #tpu.dot_dimension_numbers<[1], [0], [0], [1], [0, 0, 1, 1], [], []>} : vector<16x384xbf16>, vector<384x512xbf16>, vector<16x512xf32> -> vector<16x512xf32>
    %7 = arith.addf %3, %6 : vector<16x512xf32>
    %c0_6 = arith.constant 0 : index
    %c0_7 = arith.constant 0 : index
    %8 = vector.load %arg5[%c0_6, %c0_7] : memref<16x512xf32, #tpu.memory_space<vmem>>, vector<16x512xf32>
    tpu.vector_store %arg5[%c0_6, %c0_7], %7 {strides = array<i32>} : memref<16x512xf32, #tpu.memory_space<vmem>>, vector<16x512xf32>,
    %c1_i32 = arith.constant 1 : i32
    %9 = arith.cmpi eq, %arg0, %c1_i32 : i32
    %10 = arith.extui %9 : i1 to i32
    %c0_i32_8 = arith.constant 0 : i32
    %11 = arith.cmpi ne, %10, %c0_i32_8 : i32
    scf.if %11 {
      %c0_9 = arith.constant 0 : index
      %c0_10 = arith.constant 0 : index
      %12 = vector.load %arg5[%c0_9, %c0_10] : memref<16x512xf32, #tpu.memory_space<vmem>>, vector<16x512xf32>
      %c0_11 = arith.constant 0 : index
      %c0_12 = arith.constant 0 : index
      %13 = vector.load %arg3[%c0_11, %c0_12] : memref<1x512xf32, #tpu.memory_space<vmem>>, vector<1x512xf32>
      %14 = vector.broadcast %13 : vector<1x512xf32> to vector<16x512xf32>
      %15 = arith.addf %12, %14 : vector<16x512xf32>
      %c0_13 = arith.constant 0 : index
      %c0_14 = arith.constant 0 : index
      %16 = vector.load %arg4[%c0_13, %c0_14] : memref<16x512xf32, #tpu.memory_space<vmem>>, vector<16x512xf32>
      tpu.vector_store %arg4[%c0_13, %c0_14], %15 {strides = array<i32>} : memref<16x512xf32, #tpu.memory_space<vmem>>, vector<16x512xf32>,
    } else {
    }
    return
  }
  func.func @transform_0(%arg0: i32) -> (i32, i32) {
    %c0_i32 = arith.constant 0 : i32
    %c0_i32_0 = arith.constant 0 : i32
    return %c0_i32, %arg0 : i32, i32
  }
  func.func @transform_1(%arg0: i32) -> (i32, i32) {
    %c0_i32 = arith.constant 0 : i32
    %c0_i32_0 = arith.constant 0 : i32
    return %arg0, %c0_i32 : i32, i32
  }
  func.func @transform_2(%arg0: i32) -> (i32, i32) {
    %c0_i32 = arith.constant 0 : i32
    %c0_i32_0 = arith.constant 0 : i32
    %c0_i32_1 = arith.constant 0 : i32
    return %c0_i32, %c0_i32_0 : i32, i32
  }
  func.func @transform_3(%arg0: i32) -> (i32, i32) {
    %c0_i32 = arith.constant 0 : i32
    %c0_i32_0 = arith.constant 0 : i32
    %c0_i32_1 = arith.constant 0 : i32
    return %c0_i32, %c0_i32_0 : i32, i32
  }
}

</mosaic_0001>

<bundles_post_ra>
// kernel: tpu_custom_call.1
= control target key start
LH: loop header
LB: loop body
LE: loop exit
PB: predicated region body
PF: predicated region fallthrough
CT: control target
= control target key end

     0   :  { %s2314_s0 = inlined_call_operand.hbm [shape: bf16[16,768], index: 0, kind: input, shape index: {}]   ;;  %s2315_s1 = inlined_call_operand.hbm [shape: bf16[768,512], index: 1, kind: input, shape index: {}]   ;;  %s2316_s2 = inlined_call_operand.hbm [shape: f32[1,512], index: 2, kind: input, shape index: {}]   ;;  %s2317_s3 = inlined_call_operand.hbm [shape: f32[16,512], index: 3, kind: output, shape index: {}]  }
   0x1   :  { %2318 = sst [smem:[#allocation14_spill]] %s2314_s0 }
   0x2   :  { %8 = vsyncpa [#allocation4], 0 }
   0x3   :  { %10 = vsyncpa [#allocation4 + $0x1], 0 }
   0x4   :  { %11 = vsyncpa [#allocation7], 0 }
   0x5   :  { %13 = vsyncpa [#allocation7 + $0x1], 0 }
   0x6   :  { %14 = vsyncpa [#allocation5], 0  ;;  %s1953_s12 = smov 0   ;;  %s1955_s13 = smov 0  }
   0x7   :  { %s1957_s14 = smov 0   ;;  %s1959_s15 = smov 0  }
   0x8 LB: > { %s1972_s16 = sadd.s32 4294967295, %s1921_s15   ;;  %s1975_s17 = sadd.s32 1, %s1921_s15   ;;  %s1921_s15 = sphi %s1959_s15, %s2327_s15   ;;  %s1917_s14 = sphi %s1957_s14, %s2326_s14   ;;  %s1913_s13 = sphi %s1955_s13, %s2325_s13   ;;  %s1909_s12 = sphi %s1953_s12, %s2324_s12  }
   0x9   : > { %s24_s18 = ssub.s32 %s1921_s15, %s1975_s17  ;;  %s27_s19 = sadd.s32 1, %s1917_s14 }
   0xa   : > { %p25_p0 = scmp.eq.s32.totalorder %s24_s18, 0  ;;  %p34_p1 = scmp.ne.s32.totalorder %s1917_s14, %s1913_s13 }
   0xb   : > { %p35_p2 = scmp.eq.s32.totalorder %s1921_s15, 0  ;;  %p40_p3 = scmp.ne.s32.totalorder %s1913_s13, %s1909_s12 }
   0xc   : > { %s1985_s20 = scalar_select %p25_p0, %s1917_s14, %s27_s19  }
   0xd   : > { %p1987_p4 = por %p35_p2, %p34_p1  ;;  %p41_p5 = scmp.eq.s32.totalorder %s1972_s16, 0 }
   0xe   : > { %p1170_p6 = scmp.ge.s32.totalorder %s1921_s15, 1  ;;  %p119_p7 = scmp.lt.s32.totalorder %s1921_s15, 3 }
   0xf   : > { %p1996_p8 = por %p41_p5, %p40_p3  ;;  %p1171_p9 = scmp.ne.s32.totalorder %s1972_s16, 0 }
  0x10   : > { %p2001_p10 = pnand %p1170_p6, %p119_p7  ;;  %s131_s26 = sshll.u32 %s2316_s2, 4  ;;  %s132_s26 = int_to_ptr.hbm [resolvable:$true] %s131_s26 }
  0x11   : > { %s1923_s27 = smov [#allocation8]   ;;  %p1711_p13 = scmp.lt.s32.totalorder %s1921_s15, 2 }
  0x12   : > { %p1699_p11 = pneg %p2001_p10  ;;  %s133_s28 = sshll.u32 %s1923_s27, 4  ;;  %s134_s28 = int_to_ptr.vmem [resolvable:$true] %s133_s28 }
  0x13   : > { %s2014_s29 = sand.u32 1, %s1917_s14   ;;  %s1580_s30 = smul.u32 12, %s1921_s15 }
  0x14   : > { %p1700_p12 = pnand %p1699_p11, %p41_p5  ;;  %p2019_p0 = pnand %p1711_p13, %p1987_p4 }
  0x15   : > { %s1683_s5 = smul.u32 24, %s2014_s29  ;;  %s2323_s0 = sld [smem:[#allocation14_spill]] }
  0x16   : > { %1702 = dma.hbm_to_vmem [thread:$0]  (!%p1700_p12), %s132_s26, 64, %s134_s28, [#allocation7]  }
  0x17   : > { %s148_s10 = scalar_lea.vmem [#allocation3], %s1683_s5  ;;  %s145_s12 = scalar_lea.sflag [#allocation4], %s2014_s29 }
  0x18   : > { %s156_s11 = sshll.u32 %s148_s10, 4  ;;  %p1791_p2 = pneg %p2019_p0  ;;  %s157_s11 = int_to_ptr.vmem [resolvable:$true] %s156_s11 }
  0x1b   : > { %s153_s8 = scalar_lea.hbm %s2323_s0, %s1580_s30  ;;  %s1794_s25 = scalar_lea.hbm %s2323_s0, 48 }
  0x1c   : > { %s154_s9 = sshll.u32 %s153_s8, 4  ;;  %s155_s9 = int_to_ptr.hbm [resolvable:$true] %s154_s9 }
  0x1d   : > { %s1787_s18 = sshra.s32 %s155_s9, 4  ;;  %s1788_s18 = int_to_ptr.hbm [resolvable:$true] %s1787_s18 }
  0x1e   : > { %s1789_s19 = scalar_lea.hbm %s1788_s18, 24  ;;  %p1795_p6 = scmp.lt.s32.totalorder %s1788_s18, %s2323_s0 }
  0x1f   : > { %p1790_p1 = scmp.ne.s32.totalorder %s1788_s18, %s1789_s19  ;;  %p1796_p7 = scmp.lt.s32.totalorder %s1794_s25, %s1789_s19 }
  0x21   : > { %p1792_p3 = pnand %p1791_p2, %p1790_p1  ;;  %p1797_p11 = por %p1796_p7, %p1795_p6 }
  0x23   : > { %p1793_p4 = pneg %p1792_p3 }
  0x25   : > { %p1798_p12 = pnand %p1797_p11, %p1793_p4 }
  0x27   : > { %1801 = shalt.err (!%p1798_p12)
}
  0x28   : > { %s1924_s28 = smov 384   ;;  %s1925_s30 = smov 192  }
  0x29   : > { %s1926_s5 = smov 12   ;;  %s166_s6 = sand.u32 1, %s1921_s15  }
  0x2a   : > { %1706 = dma.hbm_to_vmem [thread:$0]  (!%p2019_p0), %s155_s9, 384, %s157_s11, %s145_s12, %s1924_s28, %s1925_s30, %s1926_s5  }
  0x2b   : > { %s1684_s7 = smul.u32 768, %s2014_s29  ;;  %s167_s26 = scalar_lea.sflag [#allocation7], %s166_s6 }
  0x2c   : > { %s1682_s8 = smul.u32 768, %s1921_s15  ;;  %s1824_s9 = scalar_lea.hbm %s2315_s1, 1536 }
  0x2d   : > { %s170_s19 = scalar_lea.vmem [#allocation6], %s1684_s7 }
  0x2e   : > { %s176_s18 = scalar_lea.hbm %s2315_s1, %s1682_s8  ;;  %s179_s24 = sshll.u32 %s170_s19, 4  ;;  %s180_s24 = int_to_ptr.vmem [resolvable:$true] %s179_s24 }
  0x2f   : > { %s177_s25 = sshll.u32 %s176_s18, 4  ;;  %s178_s25 = int_to_ptr.hbm [resolvable:$true] %s177_s25 }
  0x30   : > { %s1817_s27 = sshra.s32 %s178_s25, 4  ;;  %s1818_s27 = int_to_ptr.hbm [resolvable:$true] %s1817_s27 }
  0x31   : > { %s1819_s0 = scalar_lea.hbm %s1818_s27, 768  ;;  %p1825_p4 = scmp.lt.s32.totalorder %s1818_s27, %s2315_s1 }
  0x32   : > { %p1820_p13 = scmp.ne.s32.totalorder %s1818_s27, %s1819_s0  ;;  %p1826_p6 = scmp.lt.s32.totalorder %s1824_s9, %s1819_s0 }
  0x34   : > { %p1822_p1 = pnand %p1820_p13, %p1791_p2  ;;  %p1827_p7 = por %p1826_p6, %p1825_p4 }
  0x36   : > { %p1823_p3 = pneg %p1822_p1 }
  0x38   : > { %p1828_p11 = pnand %p1827_p7, %p1823_p3 }
  0x3a   : > { %1831 = shalt.err (!%p1828_p11)
}
  0x3b   : > { %s1927_s28 = smov 256   ;;  %s1928_s30 = smov 16  }
  0x3c   : > { %1709 = dma.hbm_to_vmem [thread:$0]  (!%p2019_p0), %s178_s25, 12288, %s180_s24, %s167_s26, %s1927_s28, %s1927_s28, %s1928_s30  }
  0x3d   : > { %191 = sbr.rel (%p2001_p10) target bundleno = 354 (0x162), region = 32  ;;  %s193_s5 = sand.u32 (!%p2001_p10), 1, %s1913_s13  }
  0x3e   : > { %s1685_s6 = smul.u32 (!%p2001_p10), 24, %s193_s5  ;;  %s194_s7 = scalar_lea.sflag (!%p2001_p10), [#allocation4], %s193_s5 }
  0x40   : > { %s2061_s8 = scalar_lea.vmem (!%p2001_p10), [#allocation3], %s1685_s6 }
  0x42   : > { %1892 = dma.done.wait (%p1996_p8), %s194_s7, 384  }
  0x43   : > { %1894 = vsyncadd (%p1996_p8), %s194_s7, 4294966912  ;;  %s203_s0 = sand.u32 1, %s1972_s16   ;;  %s1686_s4 = smul.u32 768, %s193_s5 }
  0x44   : > { %s204_s10 = scalar_lea.sflag [#allocation7], %s203_s0 }
  0x45   : > { %s2068_s21 = scalar_lea.vmem [#allocation6], %s1686_s4 }
  0x46   : > { %1896 = dma.done.wait (%p1996_p8), %s204_s10, 12288  }
  0x47   : > { %1898 = vsyncadd (%p1996_p8), %s204_s10, 4294955008 }
  0x48   : > { %1900 = dma.done.wait (%p41_p5), [#allocation7], 64  }
  0x49   : > { %1902 = vsyncadd (%p41_p5), [#allocation7], 4294967232  ;;  %241 = sbr.rel (%p1171_p9) target bundleno = 87 (0x57), region = 48 }
  0x4e   : > { %v1929_v0 = vmov 0.0  }
  0x4f   : > { %242 = vst [vmem:[#allocation2 + $0x30] sm:$0xff] %v1929_v0 }
  0x50   : > { %243 = vst [vmem:[#allocation2] sm:$0xff] %v1929_v0 }
  0x51   : > { %244 = vst [vmem:[#allocation2 + $0x18] sm:$0xff] %v1929_v0 }
  0x52   : > { %245 = vst [vmem:[#allocation2 + $0x10] sm:$0xff] %v1929_v0 }
  0x53   : > { %246 = vst [vmem:[#allocation2 + $0x8] sm:$0xff] %v1929_v0 }
  0x54   : > { %247 = vst [vmem:[#allocation2 + $0x20] sm:$0xff] %v1929_v0 }
  0x55   : > { %248 = vst [vmem:[#allocation2 + $0x28] sm:$0xff] %v1929_v0 }
  0x56   : > { %249 = vst [vmem:[#allocation2 + $0x38] sm:$0xff] %v1929_v0 }
  0x57 PF: > { %v1305_v1 = vld [vmem:[%s2068_s21 + $0xe0] sm:$0xf]  ;;  %v1616_v2 = vld [vmem:[%s2068_s21 + $0xec] sm:$0xf0]  ;;  %v1614_v10 = vld [vmem:[%s2068_s21 + $0xe4] sm:$0xf] }
  0x58   : > { %v1433_v3 = vld [vmem:[%s2068_s21 + $0x1e0] sm:$0xf]  ;;  %v1306_v4 = vor.u32 %v1616_v2, %v1305_v1  ;;  %v1648_v5 = vld [vmem:[%s2068_s21 + $0x1ec] sm:$0xf0]  ;;  %v1307_v11 = vld [vmem:[%s2068_s21 + $0xf0] sm:$0xf0] }
  0x59   : > { %v1561_v6 = vld [vmem:[%s2068_s21 + $0x2e0] sm:$0xf]  ;;  %v1680_v7 = vld [vmem:[%s2068_s21 + $0x2ec] sm:$0xf0]  ;;  %v1434_v8 = vor.u32 %v1648_v5, %v1433_v3  ;;  %v1310_v13 = vor.u32 %v1614_v10, %v1307_v11  ;;  %v1610_v21 = vld [vmem:[%s2068_s21 + $0xc4] sm:$0xf] }
  0x5a   : > { %v1562_v9 = vor.u32 %v1680_v7, %v1561_v6  ;;  %v1289_v12 = vld [vmem:[%s2068_s21 + $0xc0] sm:$0xf]  ;;  %854 = vmatpush.bf16.msra.mxu0 %v1306_v4  ;;  %v1612_v14 = vld [vmem:[%s2068_s21 + $0xcc] sm:$0xf0]  ;;  %v1291_v23 = vld [vmem:[%s2068_s21 + $0xd0] sm:$0xf0] }
  0x5b   : > { %v1417_v15 = vld [vmem:[%s2068_s21 + $0x1c0] sm:$0xf]  ;;  %v1644_v16 = vld [vmem:[%s2068_s21 + $0x1cc] sm:$0xf0]  ;;  %868 = vmatpush.bf16.msra.mxu1 %v1434_v8  ;;  %v1290_v17 = vor.u32 %v1612_v14, %v1289_v12  ;;  %896 = vmatpush.bf16.msra.mxu3 %v1310_v13  ;;  %v1294_v26 = vor.u32 %v1610_v21, %v1291_v23  ;;  %v1606_v32 = vld [vmem:[%s2068_s21 + $0xa4] sm:$0xf] }
  0x5c   : > { %882 = vmatpush.bf16.msra.mxu2 %v1562_v9  ;;  %v1418_v18 = vor.u32 %v1644_v16, %v1417_v15  ;;  %v1545_v19 = vld [vmem:[%s2068_s21 + $0x2c0] sm:$0xf]  ;;  %v1676_v20 = vld [vmem:[%s2068_s21 + $0x2cc] sm:$0xf0]  ;;  %v1275_v33 = vld [vmem:[%s2068_s21 + $0xb0] sm:$0xf0] }
  0x5d   : > { %v1546_v22 = vor.u32 %v1676_v20, %v1545_v19  ;;  %v1273_v24 = vld [vmem:[%s2068_s21 + $0xa0] sm:$0xf]  ;;  %v1608_v25 = vld [vmem:[%s2068_s21 + $0xac] sm:$0xf0]  ;;  %v1278_v39 = vor.u32 %v1606_v32, %v1275_v33  ;;  %v1602_v43 = vld [vmem:[%s2068_s21 + $0x84] sm:$0xf] }
  0x5e   : > { %v1401_v27 = vld [vmem:[%s2068_s21 + $0x1a0] sm:$0xf]  ;;  %v1640_v28 = vld [vmem:[%s2068_s21 + $0x1ac] sm:$0xf0]  ;;  %855 = vmatpush.bf16.msra.mxu0 %v1290_v17  ;;  %v1274_v30 = vor.u32 %v1608_v25, %v1273_v24  ;;  %v1259_v44 = vld [vmem:[%s2068_s21 + $0x90] sm:$0xf0] }
  0x5f   : > { %v1529_v29 = vld [vmem:[%s2068_s21 + $0x2a0] sm:$0xf]  ;;  %v1672_v31 = vld [vmem:[%s2068_s21 + $0x2ac] sm:$0xf0]  ;;  %869 = vmatpush.bf16.msra.mxu1 %v1418_v18  ;;  %v1402_v34 = vor.u32 %v1640_v28, %v1401_v27  ;;  %897 = vmatpush.bf16.msra.mxu3 %v1294_v26  ;;  %v1262_v51 = vor.u32 %v1602_v43, %v1259_v44  ;;  %v1598_v55 = vld [vmem:[%s2068_s21 + $0x64] sm:$0xf] }
  0x60   : > { %883 = vmatpush.bf16.msra.mxu2 %v1546_v22  ;;  %v1530_v35 = vor.u32 %v1672_v31, %v1529_v29  ;;  %v1257_v36 = vld [vmem:[%s2068_s21 + $0x80] sm:$0xf]  ;;  %v1604_v37 = vld [vmem:[%s2068_s21 + $0x8c] sm:$0xf0]  ;;  %v1243_v56 = vld [vmem:[%s2068_s21 + $0x70] sm:$0xf0] }
  0x61   : > { %v1385_v38 = vld [vmem:[%s2068_s21 + $0x180] sm:$0xf]  ;;  %v1636_v40 = vld [vmem:[%s2068_s21 + $0x18c] sm:$0xf0]  ;;  %v1258_v45 = vor.u32 %v1604_v37, %v1257_v36  ;;  %v1246_v63 = vor.u32 %v1598_v55, %v1243_v56  ;;  %v1594_v3 = vld [vmem:[%s2068_s21 + $0x44] sm:$0xf] }
  0x62   : > { %v1513_v41 = vld [vmem:[%s2068_s21 + $0x280] sm:$0xf]  ;;  %v1668_v42 = vld [vmem:[%s2068_s21 + $0x28c] sm:$0xf0]  ;;  %856 = vmatpush.bf16.msra.mxu0 %v1274_v30  ;;  %v1386_v46 = vor.u32 %v1636_v40, %v1385_v38  ;;  %v1227_v4 = vld [vmem:[%s2068_s21 + $0x50] sm:$0xf0] }
  0x63   : > { %870 = vmatpush.bf16.msra.mxu1 %v1402_v34  ;;  %v1514_v47 = vor.u32 %v1668_v42, %v1513_v41  ;;  %v1241_v48 = vld [vmem:[%s2068_s21 + $0x60] sm:$0xf]  ;;  %v1600_v49 = vld [vmem:[%s2068_s21 + $0x6c] sm:$0xf0]  ;;  %898 = vmatpush.bf16.msra.mxu3 %v1278_v39  ;;  %v1230_v11 = vor.u32 %v1594_v3, %v1227_v4  ;;  %v1590_v15 = vld [vmem:[%s2068_s21 + $0x24] sm:$0xf] }
  0x64   : > { %884 = vmatpush.bf16.msra.mxu2 %v1530_v35  ;;  %v1369_v50 = vld [vmem:[%s2068_s21 + $0x160] sm:$0xf]  ;;  %v1632_v52 = vld [vmem:[%s2068_s21 + $0x16c] sm:$0xf0]  ;;  %v1242_v57 = vor.u32 %v1600_v49, %v1241_v48  ;;  %v1211_v16 = vld [vmem:[%s2068_s21 + $0x30] sm:$0xf0] }
  0x65   : > { %v1497_v53 = vld [vmem:[%s2068_s21 + $0x260] sm:$0xf]  ;;  %v1664_v54 = vld [vmem:[%s2068_s21 + $0x26c] sm:$0xf0]  ;;  %v1370_v58 = vor.u32 %v1632_v52, %v1369_v50  ;;  %v1214_v25 = vor.u32 %v1590_v15, %v1211_v16  ;;  %v1586_v27 = vld [vmem:[%s2068_s21 + $0x4] sm:$0xf] }
  0x66   : > { %857 = vmatpush.bf16.msra.mxu0 %v1258_v45  ;;  %v1498_v59 = vor.u32 %v1664_v54, %v1497_v53  ;;  %v1225_v60 = vld [vmem:[%s2068_s21 + $0x40] sm:$0xf]  ;;  %v1596_v61 = vld [vmem:[%s2068_s21 + $0x4c] sm:$0xf0]  ;;  %v1195_v28 = vld [vmem:[%s2068_s21 + $0x10] sm:$0xf0] }
  0x67   : > { %871 = vmatpush.bf16.msra.mxu1 %v1386_v46  ;;  %v1353_v62 = vld [vmem:[%s2068_s21 + $0x140] sm:$0xf]  ;;  %899 = vmatpush.bf16.msra.mxu3 %v1262_v51  ;;  %v1628_v0 = vld [vmem:[%s2068_s21 + $0x14c] sm:$0xf0]  ;;  %v1226_v5 = vor.u32 %v1596_v61, %v1225_v60  ;;  %v1646_v29 = vld [vmem:[%s2068_s21 + $0x1e4] sm:$0xf]  ;;  %v1198_v40 = vor.u32 %v1586_v27, %v1195_v28 }
  0x68   : > { %885 = vmatpush.bf16.msra.mxu2 %v1514_v47  ;;  %v1481_v1 = vld [vmem:[%s2068_s21 + $0x240] sm:$0xf]  ;;  %v1660_v2 = vld [vmem:[%s2068_s21 + $0x24c] sm:$0xf0]  ;;  %v1354_v6 = vor.u32 %v1628_v0, %v1353_v62  ;;  %v1435_v30 = vld [vmem:[%s2068_s21 + $0x1f0] sm:$0xf0] }
  0x69   : > { %v1482_v7 = vor.u32 %v1660_v2, %v1481_v1  ;;  %v1209_v8 = vld [vmem:[%s2068_s21 + $0x20] sm:$0xf]  ;;  %v1592_v9 = vld [vmem:[%s2068_s21 + $0x2c] sm:$0xf0]  ;;  %v1678_v31 = vld [vmem:[%s2068_s21 + $0x2e4] sm:$0xf]  ;;  %v1438_v41 = vor.u32 %v1646_v29, %v1435_v30 }
  0x6a   : > { %858 = vmatpush.bf16.msra.mxu0 %v1242_v57  ;;  %v1337_v10 = vld [vmem:[%s2068_s21 + $0x120] sm:$0xf]  ;;  %v1624_v12 = vld [vmem:[%s2068_s21 + $0x12c] sm:$0xf0]  ;;  %v1210_v17 = vor.u32 %v1592_v9, %v1209_v8  ;;  %v1563_v33 = vld [vmem:[%s2068_s21 + $0x2f0] sm:$0xf0] }
  0x6b   : > { %872 = vmatpush.bf16.msra.mxu1 %v1370_v58  ;;  %900 = vmatpush.bf16.msra.mxu3 %v1246_v63  ;;  %v1465_v13 = vld [vmem:[%s2068_s21 + $0x220] sm:$0xf]  ;;  %v1656_v14 = vld [vmem:[%s2068_s21 + $0x22c] sm:$0xf0]  ;;  %v1338_v20 = vor.u32 %v1624_v12, %v1337_v10  ;;  %v1313_v34 = vld [vmem:[%s2068_s21 + $0xe8] sm:$0xf]  ;;  %v1566_v43 = vor.u32 %v1678_v31, %v1563_v33 }
  0x6c   : > { %886 = vmatpush.bf16.msra.mxu2 %v1498_v59  ;;  %v1193_v18 = vld [vmem:[%s2068_s21] sm:$0xf]  ;;  %v1588_v19 = vld [vmem:[%s2068_s21 + $0xc] sm:$0xf0]  ;;  %v1466_v21 = vor.u32 %v1656_v14, %v1465_v13  ;;  %v1617_v35 = vld [vmem:[%s2068_s21 + $0xf4] sm:$0xf0] }
  0x6d   : > { %v1321_v22 = vld [vmem:[%s2068_s21 + $0x100] sm:$0xf]  ;;  %v1620_v23 = vld [vmem:[%s2068_s21 + $0x10c] sm:$0xf0]  ;;  %v1194_v32 = vor.u32 %v1588_v19, %v1193_v18  ;;  %v1441_v38 = vld [vmem:[%s2068_s21 + $0x1e8] sm:$0xf]  ;;  %v1314_v44 = vor.u32 %v1617_v35, %v1313_v34 }
  0x6e   : > { %859 = vmatpush.bf16.msra.mxu0 %v1226_v5  ;;  %v1449_v24 = vld [vmem:[%s2068_s21 + $0x200] sm:$0xf]  ;;  %v1652_v26 = vld [vmem:[%s2068_s21 + $0x20c] sm:$0xf0]  ;;  %v1322_v36 = vor.u32 %v1620_v23, %v1321_v22  ;;  %v1649_v39 = vld [vmem:[%s2068_s21 + $0x1f4] sm:$0xf0] }
  0x6f   : > { %873 = vmatpush.bf16.msra.mxu1 %v1354_v6  ;;  %901 = vmatpush.bf16.msra.mxu3 %v1230_v11  ;;  %v1450_v37 = vor.u32 %v1652_v26, %v1449_v24  ;;  %v1642_v42 = vld [vmem:[%s2068_s21 + $0x1c4] sm:$0xf]  ;;  %v1419_v45 = vld [vmem:[%s2068_s21 + $0x1d0] sm:$0xf0]  ;;  %v1442_v48 = vor.u32 %v1649_v39, %v1441_v38  ;;  %v1297_v49 = vld [vmem:[%s2068_s21 + $0xc8] sm:$0xf] }
  0x70   : > { %887 = vmatpush.bf16.msra.mxu2 %v1482_v7  ;;  %v1674_v46 = vld [vmem:[%s2068_s21 + $0x2c4] sm:$0xf]  ;;  %v1547_v47 = vld [vmem:[%s2068_s21 + $0x2d0] sm:$0xf0]  ;;  %v1613_v50 = vld [vmem:[%s2068_s21 + $0xd4] sm:$0xf0]  ;;  %v1422_v55 = vor.u32 %v1642_v42, %v1419_v45 }
  0x71   : > { %v1425_v51 = vld [vmem:[%s2068_s21 + $0x1c8] sm:$0xf]  ;;  %v1645_v52 = vld [vmem:[%s2068_s21 + $0x1d4] sm:$0xf0]  ;;  %v1584_v54 = vld [vmem:[%s2061_s8 + $0x8] sm:$0xf0]  ;;  %v1550_v60 = vor.u32 %v1674_v46, %v1547_v47  ;;  %v1298_v61 = vor.u32 %v1613_v50, %v1297_v49 }
  0x72   : > { %860 = vmatpush.bf16.msra.mxu0 %v1210_v17  ;;  %v1181_v53 = vld [vmem:[%s2061_s8] sm:$0xf]  ;;  %v1638_v56 = vld [vmem:[%s2068_s21 + $0x1a4] sm:$0xf]  ;;  %v1403_v57 = vld [vmem:[%s2068_s21 + $0x1b0] sm:$0xf0]  ;;  %v1426_v1 = vor.u32 %v1645_v52, %v1425_v51 }
  0x73   : > { %874 = vmatpush.bf16.msra.mxu1 %v1338_v20  ;;  %902 = vmatpush.bf16.msra.mxu3 %v1214_v25  ;;  %v1670_v58 = vld [vmem:[%s2068_s21 + $0x2a4] sm:$0xf]  ;;  %v2165_v59 = vor.u32 %v1584_v54, %v1181_v53  ;;  %v1531_v62 = vld [vmem:[%s2068_s21 + $0x2b0] sm:$0xf0]  ;;  %v1281_v63 = vld [vmem:[%s2068_s21 + $0xa8] sm:$0xf]  ;;  %v1406_v9 = vor.u32 %v1638_v56, %v1403_v57 }
  0x74   : > { %888 = vmatpush.bf16.msra.mxu2 %v1466_v21  ;;  %v1609_v0 = vld [vmem:[%s2068_s21 + $0xb4] sm:$0xf0]  ;;  %v1409_v2 = vld [vmem:[%s2068_s21 + $0x1a8] sm:$0xf]  ;;  %v1583_v3 = vld [vmem:[%s2061_s8 + $0x4] sm:$0xf]  ;;  %v1534_v11 = vor.u32 %v1670_v58, %v1531_v62 }
  0x75   : > { %v1183_v4 = vld [vmem:[%s2061_s8 + $0xc] sm:$0xf0]  ;;  %v1189_v7 = vld [vmem:[%s2061_s8 + $0x8] sm:$0xf]  ;;  %v1585_v8 = vld [vmem:[%s2061_s8 + $0x10] sm:$0xf0]  ;;  %v1282_v12 = vor.u32 %v1609_v0, %v1281_v63 }
  0x76   : > { %861 = vmatpush.bf16.msra.mxu0 %v1194_v32  ;;  %v1641_v5 = vld [vmem:[%s2068_s21 + $0x1b4] sm:$0xf0]  ;;  %v2175_v6 = vor.u32 %v1583_v3, %v1183_v4  ;;  %v2180_v10 = vor.u32 %v1585_v8, %v1189_v7  ;;  %v1634_v13 = vld [vmem:[%s2068_s21 + $0x184] sm:$0xf]  ;;  %v1387_v14 = vld [vmem:[%s2068_s21 + $0x190] sm:$0xf0] }
  0x77   : > { %875 = vmatpush.bf16.msra.mxu1 %v1322_v36  ;;  %903 = vmatpush.bf16.msra.mxu3 %v1198_v40  ;;  %v1666_v15 = vld [vmem:[%s2068_s21 + $0x284] sm:$0xf]  ;;  %v1410_v16 = vor.u32 %v1641_v5, %v1409_v2  ;;  %v1515_v17 = vld [vmem:[%s2068_s21 + $0x290] sm:$0xf0]  ;;  %v1265_v18 = vld [vmem:[%s2068_s21 + $0x88] sm:$0xf]  ;;  %v1390_v22 = vor.u32 %v1634_v13, %v1387_v14 }
  0x78   : > { %889 = vmatpush.bf16.msra.mxu2 %v1450_v37  ;;  %v1605_v19 = vld [vmem:[%s2068_s21 + $0x94] sm:$0xf0]  ;;  %v1393_v20 = vld [vmem:[%s2068_s21 + $0x188] sm:$0xf]  ;;  %v1518_v23 = vor.u32 %v1666_v15, %v1515_v17  ;;  %v1630_v25 = vld [vmem:[%s2068_s21 + $0x164] sm:$0xf] }
  0x79   : > { %862 = vmatmul.bf16.vlgmr.msra.gmra.mxu0 %v2165_v59  ;;  %v1637_v21 = vld [vmem:[%s2068_s21 + $0x194] sm:$0xf0]  ;;  %v1266_v24 = vor.u32 %v1605_v19, %v1265_v18  ;;  %v1371_v26 = vld [vmem:[%s2068_s21 + $0x170] sm:$0xf0]  ;;  %v1662_v27 = vld [vmem:[%s2068_s21 + $0x264] sm:$0xf] }
  0x7a   : > { %910 = vmatpush.bf16.msrb.mxu0 %v1438_v41  ;;  %904 = vmatmul.bf16.vlgmr.msra.gmra.mxu3 %v2165_v59  ;;  %v1394_v28 = vor.u32 %v1637_v21, %v1393_v20  ;;  %v1499_v29 = vld [vmem:[%s2068_s21 + $0x270] sm:$0xf0]  ;;  %v1249_v30 = vld [vmem:[%s2068_s21 + $0x68] sm:$0xf]  ;;  %v1601_v31 = vld [vmem:[%s2068_s21 + $0x74] sm:$0xf0]  ;;  %v1374_v34 = vor.u32 %v1630_v25, %v1371_v26 }
  0x7b   : > { %924 = vmatpush.bf16.msrb.mxu1 %v1566_v43  ;;  %952 = vmatpush.bf16.msrb.mxu3 %v1442_v48  ;;  %v1377_v32 = vld [vmem:[%s2068_s21 + $0x168] sm:$0xf]  ;;  %v1633_v33 = vld [vmem:[%s2068_s21 + $0x174] sm:$0xf0]  ;;  %v1502_v35 = vor.u32 %v1662_v27, %v1499_v29  ;;  %v1250_v36 = vor.u32 %v1601_v31, %v1249_v30  ;;  %v1626_v37 = vld [vmem:[%s2068_s21 + $0x144] sm:$0xf] }
  0x7c   : > { %938 = vmatpush.bf16.msrb.mxu2 %v1314_v44  ;;  %876 = vmatmul.bf16.vlgmr.msra.gmra.mxu1 %v2175_v6  ;;  %v1355_v38 = vld [vmem:[%s2068_s21 + $0x150] sm:$0xf0]  ;;  %v1658_v39 = vld [vmem:[%s2068_s21 + $0x244] sm:$0xf]  ;;  %v1378_v40 = vor.u32 %v1633_v33, %v1377_v32  ;;  %v1233_v42 = vld [vmem:[%s2068_s21 + $0x48] sm:$0xf] }
  0x7d   : > { %890 = vmatmul.bf16.vlgmr.msra.gmra.mxu2 %v2180_v10  ;;  %v1483_v41 = vld [vmem:[%s2068_s21 + $0x250] sm:$0xf0]  ;;  %v1597_v43 = vld [vmem:[%s2068_s21 + $0x54] sm:$0xf0]  ;;  %v1361_v44 = vld [vmem:[%s2068_s21 + $0x148] sm:$0xf]  ;;  %v1358_v46 = vor.u32 %v1626_v37, %v1355_v38 }
  0x7e   : > { %911 = vmatpush.bf16.msrb.mxu0 %v1422_v55  ;;  %v1629_v45 = vld [vmem:[%s2068_s21 + $0x154] sm:$0xf0]  ;;  %v1486_v47 = vor.u32 %v1658_v39, %v1483_v41  ;;  %v1234_v48 = vor.u32 %v1597_v43, %v1233_v42  ;;  %v1622_v49 = vld [vmem:[%s2068_s21 + $0x124] sm:$0xf]  ;;  %v1339_v50 = vld [vmem:[%s2068_s21 + $0x130] sm:$0xf0] }
  0x7f   : > { %925 = vmatpush.bf16.msrb.mxu1 %v1550_v60  ;;  %953 = vmatpush.bf16.msrb.mxu3 %v1426_v1  ;;  %v1654_v51 = vld [vmem:[%s2068_s21 + $0x224] sm:$0xf]  ;;  %v1362_v52 = vor.u32 %v1629_v45, %v1361_v44  ;;  %v1467_v53 = vld [vmem:[%s2068_s21 + $0x230] sm:$0xf0]  ;;  %v1217_v54 = vld [vmem:[%s2068_s21 + $0x28] sm:$0xf]  ;;  %v1342_v58 = vor.u32 %v1622_v49, %v1339_v50 }
  0x80   : > { %939 = vmatpush.bf16.msrb.mxu2 %v1298_v61  ;;  %v1593_v55 = vld [vmem:[%s2068_s21 + $0x34] sm:$0xf0]  ;;  %v1345_v56 = vld [vmem:[%s2068_s21 + $0x128] sm:$0xf]  ;;  %v1618_v60 = vld [vmem:[%s2068_s21 + $0x104] sm:$0xf]  ;;  %v1470_v62 = vor.u32 %v1654_v51, %v1467_v53 }
  0x81   : > { %v1625_v57 = vld [vmem:[%s2068_s21 + $0x134] sm:$0xf0]  ;;  %v1323_v61 = vld [vmem:[%s2068_s21 + $0x110] sm:$0xf0]  ;;  %v1218_v63 = vor.u32 %v1593_v55, %v1217_v54  ;;  %v1650_v0 = vld [vmem:[%s2068_s21 + $0x204] sm:$0xf] }
  0x82   : > { %912 = vmatpush.bf16.msrb.mxu0 %v1406_v9  ;;  %v1451_v1 = vld [vmem:[%s2068_s21 + $0x210] sm:$0xf0]  ;;  %v1201_v2 = vld [vmem:[%s2068_s21 + $0x8] sm:$0xf]  ;;  %v1346_v3 = vor.u32 %v1625_v57, %v1345_v56  ;;  %v1589_v4 = vld [vmem:[%s2068_s21 + $0x14] sm:$0xf0] }
  0x83   : > { %926 = vmatpush.bf16.msrb.mxu1 %v1534_v11  ;;  %954 = vmatpush.bf16.msrb.mxu3 %v1410_v16  ;;  %v1329_v5 = vld [vmem:[%s2068_s21 + $0x108] sm:$0xf]  ;;  %v1621_v7 = vld [vmem:[%s2068_s21 + $0x114] sm:$0xf0]  ;;  %v1615_v11 = vld [vmem:[%s2068_s21 + $0xec] sm:$0xf]  ;;  %v1454_v16 = vor.u32 %v1650_v0, %v1451_v1  ;;  %v1202_v17 = vor.u32 %v1589_v4, %v1201_v2 }
  0x84   : > { %940 = vmatpush.bf16.msrb.mxu2 %v1282_v12  ;;  %v1569_v8 = vld [vmem:[%s2068_s21 + $0x2e8] sm:$0xf]  ;;  %v1681_v9 = vld [vmem:[%s2068_s21 + $0x2f4] sm:$0xf0]  ;;  %v1326_v12 = vor.u32 %v1618_v60, %v1323_v61  ;;  %v1315_v13 = vld [vmem:[%s2068_s21 + $0xf8] sm:$0xf0]  ;;  %v1330_v20 = vor.u32 %v1621_v7, %v1329_v5 }
  0x85   : > { %v1647_v14 = vld [vmem:[%s2068_s21 + $0x1ec] sm:$0xf]  ;;  %v1443_v15 = vld [vmem:[%s2068_s21 + $0x1f8] sm:$0xf0]  ;;  %v1570_v21 = vor.u32 %v1681_v9, %v1569_v8  ;;  %v1677_v25 = vld [vmem:[%s2068_s21 + $0x2d4] sm:$0xf0] }
  0x86   : > { %913 = vmatpush.bf16.msrb.mxu0 %v1390_v22  ;;  %v1679_v18 = vld [vmem:[%s2068_s21 + $0x2ec] sm:$0xf]  ;;  %v1571_v19 = vld [vmem:[%s2068_s21 + $0x2f8] sm:$0xf0]  ;;  %v1318_v22 = vor.u32 %v1615_v11, %v1315_v13  ;;  %v1673_v37 = vld [vmem:[%s2068_s21 + $0x2b4] sm:$0xf0] }
  0x87   : > { %927 = vmatpush.bf16.msrb.mxu1 %v1518_v23  ;;  %955 = vmatpush.bf16.msrb.mxu3 %v1394_v28  ;;  %v1446_v23 = vor.u32 %v1647_v14, %v1443_v15  ;;  %v1611_v26 = vld [vmem:[%s2068_s21 + $0xcc] sm:$0xf]  ;;  %v1574_v27 = vor.u32 %v1679_v18, %v1571_v19  ;;  %v1299_v28 = vld [vmem:[%s2068_s21 + $0xd8] sm:$0xf0]  ;;  %v1669_v49 = vld [vmem:[%s2068_s21 + $0x294] sm:$0xf0] }
  0x88   : > { %941 = vmatpush.bf16.msrb.mxu2 %v1266_v24  ;;  %v1553_v24 = vld [vmem:[%s2068_s21 + $0x2c8] sm:$0xf]  ;;  %v1643_v29 = vld [vmem:[%s2068_s21 + $0x1cc] sm:$0xf]  ;;  %v1427_v30 = vld [vmem:[%s2068_s21 + $0x1d8] sm:$0xf0] }
  0x89   : > { %v1675_v31 = vld [vmem:[%s2068_s21 + $0x2cc] sm:$0xf]  ;;  %v1555_v32 = vld [vmem:[%s2068_s21 + $0x2d8] sm:$0xf0]  ;;  %v1554_v33 = vor.u32 %v1677_v25, %v1553_v24  ;;  %v1505_v61 = vld [vmem:[%s2068_s21 + $0x268] sm:$0xf] }
  0x8a   : > { %914 = vmatpush.bf16.msrb.mxu0 %v1374_v34  ;;  %v1302_v34 = vor.u32 %v1611_v26, %v1299_v28  ;;  %v1607_v38 = vld [vmem:[%s2068_s21 + $0xac] sm:$0xf]  ;;  %v1558_v39 = vor.u32 %v1675_v31, %v1555_v32  ;;  %v1411_v42 = vld [vmem:[%s2068_s21 + $0x1b8] sm:$0xf0]  ;;  %v1489_v11 = vld [vmem:[%s2068_s21 + $0x248] sm:$0xf] }
  0x8b   : > { %928 = vmatpush.bf16.msrb.mxu1 %v1502_v35  ;;  %956 = vmatpush.bf16.msrb.mxu3 %v1378_v40  ;;  %v1430_v35 = vor.u32 %v1643_v29, %v1427_v30  ;;  %v1283_v40 = vld [vmem:[%s2068_s21 + $0xb8] sm:$0xf0]  ;;  %v1639_v41 = vld [vmem:[%s2068_s21 + $0x1ac] sm:$0xf]  ;;  %v1657_v24 = vld [vmem:[%s2068_s21 + $0x234] sm:$0xf0] }
  0x8c   : > { %942 = vmatpush.bf16.msrb.mxu2 %v1250_v36  ;;  %v1537_v36 = vld [vmem:[%s2068_s21 + $0x2a8] sm:$0xf]  ;;  %v1671_v43 = vld [vmem:[%s2068_s21 + $0x2ac] sm:$0xf]  ;;  %v1539_v44 = vld [vmem:[%s2068_s21 + $0x2b8] sm:$0xf0] }
  0x8d   : > { %v1538_v45 = vor.u32 %v1673_v37, %v1537_v36  ;;  %v1603_v50 = vld [vmem:[%s2068_s21 + $0x8c] sm:$0xf]  ;;  %v1542_v51 = vor.u32 %v1671_v43, %v1539_v44  ;;  %v1395_v54 = vld [vmem:[%s2068_s21 + $0x198] sm:$0xf0]  ;;  %v1653_v36 = vld [vmem:[%s2068_s21 + $0x214] sm:$0xf0] }
  0x8e   : > { %915 = vmatpush.bf16.msrb.mxu0 %v1358_v46  ;;  %v1286_v46 = vor.u32 %v1607_v38, %v1283_v40  ;;  %v1635_v53 = vld [vmem:[%s2068_s21 + $0x18c] sm:$0xf]  ;;  %v1523_v56 = vld [vmem:[%s2068_s21 + $0x298] sm:$0xf0]  ;;  %p1575_p5 = scmp.ne.s32.totalorder %s1972_s16, 1 }
  0x8f   : > { %929 = vmatpush.bf16.msrb.mxu1 %v1486_v47  ;;  %957 = vmatpush.bf16.msrb.mxu3 %v1362_v52  ;;  %v1414_v47 = vor.u32 %v1639_v41, %v1411_v42  ;;  %v1267_v52 = vld [vmem:[%s2068_s21 + $0x98] sm:$0xf0]  ;;  %v1667_v55 = vld [vmem:[%s2068_s21 + $0x28c] sm:$0xf]  ;;  %v1398_v60 = vor.u32 %v1635_v53, %v1395_v54 }
  0x90   : > { %943 = vmatpush.bf16.msrb.mxu2 %v1234_v48  ;;  %v1521_v48 = vld [vmem:[%s2068_s21 + $0x288] sm:$0xf]  ;;  %v1526_v0 = vor.u32 %v1667_v55, %v1523_v56  ;;  %v1251_v1 = vld [vmem:[%s2068_s21 + $0x78] sm:$0xf0]  ;;  %v1631_v2 = vld [vmem:[%s2068_s21 + $0x16c] sm:$0xf] }
  0x91   : > { %v1522_v57 = vor.u32 %v1669_v49, %v1521_v48  ;;  %v1663_v4 = vld [vmem:[%s2068_s21 + $0x26c] sm:$0xf]  ;;  %v1507_v5 = vld [vmem:[%s2068_s21 + $0x278] sm:$0xf0] }
  0x92   : > { %916 = vmatpush.bf16.msrb.mxu0 %v1342_v58  ;;  %v1270_v58 = vor.u32 %v1603_v50, %v1267_v52  ;;  %v1595_v13 = vld [vmem:[%s2068_s21 + $0x4c] sm:$0xf]  ;;  %v1510_v14 = vor.u32 %v1663_v4, %v1507_v5  ;;  %v1235_v15 = vld [vmem:[%s2068_s21 + $0x58] sm:$0xf0] }
  0x93   : > { %930 = vmatpush.bf16.msrb.mxu1 %v1470_v62  ;;  %958 = vmatpush.bf16.msrb.mxu3 %v1346_v3  ;;  %v1665_v62 = vld [vmem:[%s2068_s21 + $0x274] sm:$0xf0]  ;;  %v1379_v3 = vld [vmem:[%s2068_s21 + $0x178] sm:$0xf0]  ;;  %v1659_v18 = vld [vmem:[%s2068_s21 + $0x24c] sm:$0xf] }
  0x94   : > { %944 = vmatpush.bf16.msrb.mxu2 %v1218_v63  ;;  %v1599_v63 = vld [vmem:[%s2068_s21 + $0x6c] sm:$0xf]  ;;  %v1506_v7 = vor.u32 %v1665_v62, %v1505_v61  ;;  %v1382_v9 = vor.u32 %v1631_v2, %v1379_v3  ;;  %v1491_v19 = vld [vmem:[%s2068_s21 + $0x258] sm:$0xf0] }
  0x95   : > { %v1254_v8 = vor.u32 %v1599_v63, %v1251_v1  ;;  %v1591_v25 = vld [vmem:[%s2068_s21 + $0x2c] sm:$0xf]  ;;  %v1494_v26 = vor.u32 %v1659_v18, %v1491_v19  ;;  %v1347_v29 = vld [vmem:[%s2068_s21 + $0x138] sm:$0xf0] }
  0x96   : > { %917 = vmatpush.bf16.msrb.mxu0 %v1326_v12  ;;  %v1661_v12 = vld [vmem:[%s2068_s21 + $0x254] sm:$0xf0]  ;;  %v1623_v28 = vld [vmem:[%s2068_s21 + $0x12c] sm:$0xf]  ;;  %v1475_v31 = vld [vmem:[%s2068_s21 + $0x238] sm:$0xf0] }
  0x97   : > { %931 = vmatpush.bf16.msrb.mxu1 %v1454_v16  ;;  %959 = vmatpush.bf16.msrb.mxu3 %v1330_v20  ;;  %v1627_v16 = vld [vmem:[%s2068_s21 + $0x14c] sm:$0xf]  ;;  %v1490_v20 = vor.u32 %v1661_v12, %v1489_v11  ;;  %v1331_v41 = vld [vmem:[%s2068_s21 + $0x118] sm:$0xf0] }
  0x98   : > { %945 = vmatpush.bf16.msrb.mxu2 %v1202_v17  ;;  %v1363_v17 = vld [vmem:[%s2068_s21 + $0x158] sm:$0xf0]  ;;  %v1655_v30 = vld [vmem:[%s2068_s21 + $0x22c] sm:$0xf] }
  0x99   : > { %918 = vmatmul.bf16.vlgmr.msrb.gmra.mxu0 %v2175_v6  ;;  %v1587_v37 = vld [vmem:[%s2068_s21 + $0xc] sm:$0xf]  ;;  %v1478_v38 = vor.u32 %v1655_v30, %v1475_v31  ;;  %v1459_v43 = vld [vmem:[%s2068_s21 + $0x218] sm:$0xf0] }
  0x9a   : > { %966 = vmatpush.bf16.msra.mxu0 %v1570_v21  ;;  %932 = vmatmul.bf16.vlgmr.msrb.gmra.mxu1 %v2180_v10  ;;  %v1238_v21 = vor.u32 %v1595_v13, %v1235_v15  ;;  %v1619_v40 = vld [vmem:[%s2068_s21 + $0x10c] sm:$0xf] }
  0x9b   : > { %980 = vmatpush.bf16.msra.mxu1 %v1318_v22  ;;  %1008 = vmatpush.bf16.msra.mxu3 %v1574_v27  ;;  %v1366_v22 = vor.u32 %v1627_v16, %v1363_v17  ;;  %v1219_v27 = vld [vmem:[%s2068_s21 + $0x38] sm:$0xf0]  ;;  %v1651_v42 = vld [vmem:[%s2068_s21 + $0x20c] sm:$0xf] }
  0x9c   : > { %994 = vmatpush.bf16.msra.mxu2 %v1446_v23  ;;  %960 = vmatmul.bf16.vlgmr.msrb.gmra.mxu3 %v2175_v6  ;;  %v1473_v23 = vld [vmem:[%s2068_s21 + $0x228] sm:$0xf] }
  0x9d   : > { %946 = vmatmul.bf16.vlgmr.msrb.gmra.mxu2 %v2165_v59  ;;  %v1474_v32 = vor.u32 %v1657_v24, %v1473_v23  ;;  %v252_v17 = vld [vmem:[#allocation2 + $0x18] sm:$0xff] }
  0x9e   : > { %967 = vmatpush.bf16.msra.mxu0 %v1554_v33  ;;  %v1222_v33 = vor.u32 %v1591_v25, %v1219_v27 }
  0x9f   : > { %981 = vmatpush.bf16.msra.mxu1 %v1302_v34  ;;  %1009 = vmatpush.bf16.msra.mxu3 %v1558_v39  ;;  %v1350_v34 = vor.u32 %v1623_v28, %v1347_v29  ;;  %v1203_v39 = vld [vmem:[%s2068_s21 + $0x18] sm:$0xf0]  ;;  %v253_v28 = vld [vmem:[#allocation2 + $0x10] sm:$0xff] }
  0xa0   : > { %995 = vmatpush.bf16.msra.mxu2 %v1430_v35  ;;  %v1457_v35 = vld [vmem:[%s2068_s21 + $0x208] sm:$0xf] }
  0xa1   : > { %v1458_v44 = vor.u32 %v1653_v36, %v1457_v35  ;;  %v257_v36 = vld [vmem:[#allocation2 + $0x38] sm:$0xff] }
  0xa2   : > { %968 = vmatpush.bf16.msra.mxu0 %v1538_v45  ;;  %v1206_v45 = vor.u32 %v1587_v37, %v1203_v39 }
  0xa3   : > { %982 = vmatpush.bf16.msra.mxu1 %v1286_v46  ;;  %1010 = vmatpush.bf16.msra.mxu3 %v1542_v51  ;;  %v1334_v46 = vor.u32 %v1619_v40, %v1331_v41  ;;  %v250_v51 = vld [vmem:[#allocation2 + $0x30] sm:$0xff] }
  0xa4   : > { %996 = vmatpush.bf16.msra.mxu2 %v1414_v47  ;;  %v1462_v47 = vor.u32 %v1651_v42, %v1459_v43 }
  0xa6   : > { %969 = vmatpush.bf16.msra.mxu0 %v1522_v57 }
  0xa7   : > { %983 = vmatpush.bf16.msra.mxu1 %v1270_v58  ;;  %1011 = vmatpush.bf16.msra.mxu3 %v1526_v0  ;;  %v254_v58 = vld [vmem:[#allocation2 + $0x8] sm:$0xff]  ;;  %v251_v0 = vld [vmem:[#allocation2] sm:$0xff] }
  0xa8   : > { %997 = vmatpush.bf16.msra.mxu2 %v1398_v60 }
  0xaa   : > { %970 = vmatpush.bf16.msra.mxu0 %v1506_v7 }
  0xab   : > { %984 = vmatpush.bf16.msra.mxu1 %v1254_v8  ;;  %1012 = vmatpush.bf16.msra.mxu3 %v1510_v14  ;;  %v255_v8 = vld [vmem:[#allocation2 + $0x20] sm:$0xff] }
  0xac   : > { %998 = vmatpush.bf16.msra.mxu2 %v1382_v9 }
  0xae   : > { %971 = vmatpush.bf16.msra.mxu0 %v1490_v20 }
  0xaf   : > { %985 = vmatpush.bf16.msra.mxu1 %v1238_v21  ;;  %1013 = vmatpush.bf16.msra.mxu3 %v1494_v26  ;;  %v256_v26 = vld [vmem:[#allocation2 + $0x28] sm:$0xff] }
  0xb0   : > { %999 = vmatpush.bf16.msra.mxu2 %v1366_v22 }
  0xb2   : > { %972 = vmatpush.bf16.msra.mxu0 %v1474_v32 }
  0xb3   : > { %986 = vmatpush.bf16.msra.mxu1 %v1222_v33  ;;  %1014 = vmatpush.bf16.msra.mxu3 %v1478_v38 }
  0xb4   : > { %1000 = vmatpush.bf16.msra.mxu2 %v1350_v34 }
  0xb6   : > { %973 = vmatpush.bf16.msra.mxu0 %v1458_v44 }
  0xb7   : > { %987 = vmatpush.bf16.msra.mxu1 %v1206_v45  ;;  %1015 = vmatpush.bf16.msra.mxu3 %v1462_v47 }
  0xb8   : > { %1001 = vmatpush.bf16.msra.mxu2 %v1334_v46 }
  0xb9   : > { %974 = vmatmul.bf16.vlgmr.msra.gmra.mxu0 %v2180_v10 }
  0xba   : > { %988 = vmatmul.bf16.vlgmr.msra.gmra.mxu1 %v2165_v59  ;;  %1016 = vmatmul.bf16.vlgmr.msra.gmra.mxu3 %v2180_v10 }
  0xbb   : > { %1002 = vmatmul.bf16.vlgmr.msra.gmra.mxu2 %v2175_v6 }
  0xf6   : > { %v863_v48 = vpop.f32.mrf.mxu0 }
  0xf9   : > { %v877_v49 = vpop.f32.mrf.mxu1 }
  0xfa   : > { %v878_v50 = vadd.f32 %v877_v49, %v863_v48 }
  0xfd   : > { %v905_v59 = vpop.f32.mrf.mxu3 }
  0xfe   : > { %v865_v55 = vpop.f32.mrf.mxu0 }
 0x100   : > { %v891_v52 = vpop.f32.mrf.mxu2 }
 0x101   : > { %v892_v53 = vadd.f32 %v891_v52, %v878_v50  ;;  %v879_v56 = vpop.f32.mrf.mxu1 }
 0x102   : > { %v880_v57 = vadd.f32 %v879_v56, %v865_v55 }
 0x103   : > { %v1022_v54 = vadd.f32 %v892_v53, %v250_v51 }
 0x105   : > { %1030 = vst [vmem:[#allocation2 + $0x30] sm:$0xff] %v1022_v54  ;;  %v907_v3 = vpop.f32.mrf.mxu3 }
 0x108   : > { %v893_v60 = vpop.f32.mrf.mxu2 }
 0x109   : > { %v894_v61 = vadd.f32 %v893_v60, %v880_v57 }
 0x10b   : > { %v1026_v62 = vadd.f32 %v894_v61, %v254_v58 }
 0x10d   : > { %1034 = vst [vmem:[#allocation2 + $0x8] sm:$0xff] %v1026_v62 }
 0x116   : > { %v919_v6 = vpop.f32.mrf.mxu0 }
 0x117   : > { %v920_v63 = vadd.f32 %v919_v6, %v905_v59  ;;  %v933_v10 = vpop.f32.mrf.mxu1 }
 0x119   : > { %v934_v1 = vadd.f32 %v933_v10, %v920_v63 }
 0x11b   : > { %v1023_v2 = vadd.f32 %v934_v1, %v251_v0 }
 0x11d   : > { %1031 = vst [vmem:[#allocation2] sm:$0xff] %v1023_v2 }
 0x11e   : > { %v921_v4 = vpop.f32.mrf.mxu0 }
 0x11f   : > { %v922_v5 = vadd.f32 %v921_v4, %v907_v3  ;;  %v935_v7 = vpop.f32.mrf.mxu1  ;;  %v961_v13 = vpop.f32.mrf.mxu3 }
 0x120   : > { %v947_v12 = vpop.f32.mrf.mxu2 }
 0x121   : > { %v936_v9 = vadd.f32 %v935_v7, %v922_v5  ;;  %v962_v14 = vadd.f32 %v961_v13, %v947_v12 }
 0x123   : > { %v1027_v11 = vadd.f32 %v936_v9, %v255_v8 }
 0x125   : > { %1035 = vst [vmem:[#allocation2 + $0x20] sm:$0xff] %v1027_v11 }
 0x127   : > { %v963_v16 = vpop.f32.mrf.mxu3 }
 0x128   : > { %v949_v15 = vpop.f32.mrf.mxu2 }
 0x129   : > { %v964_v22 = vadd.f32 %v963_v16, %v949_v15 }
 0x136   : > { %v975_v18 = vpop.f32.mrf.mxu0 }
 0x137   : > { %v976_v19 = vadd.f32 %v975_v18, %v962_v14  ;;  %v989_v21 = vpop.f32.mrf.mxu1 }
 0x139   : > { %v1024_v20 = vadd.f32 %v976_v19, %v252_v17 }
 0x13b   : > { %1032 = vst [vmem:[#allocation2 + $0x18] sm:$0xff] %v1024_v20 }
 0x13d   : > { %v1017_v25 = vpop.f32.mrf.mxu3 }
 0x13e   : > { %v1003_v23 = vpop.f32.mrf.mxu2  ;;  %v977_v27 = vpop.f32.mrf.mxu0 }
 0x13f   : > { %v1004_v24 = vadd.f32 %v1003_v23, %v989_v21  ;;  %v978_v29 = vadd.f32 %v977_v27, %v964_v22  ;;  %v991_v33 = vpop.f32.mrf.mxu1 }
 0x141   : > { %v1018_v30 = vadd.f32 %v1017_v25, %v1004_v24  ;;  %v1028_v31 = vadd.f32 %v978_v29, %v256_v26 }
 0x143   : > { %v1025_v32 = vadd.f32 %v1018_v30, %v253_v28  ;;  %1036 = vst [vmem:[#allocation2 + $0x28] sm:$0xff] %v1028_v31 }
 0x145   : > { %1033 = vst [vmem:[#allocation2 + $0x10] sm:$0xff] %v1025_v32  ;;  %v1019_v37 = vpop.f32.mrf.mxu3 }
 0x146   : > { %v1005_v34 = vpop.f32.mrf.mxu2 }
 0x147   : > { %v1006_v35 = vadd.f32 %v1005_v34, %v991_v33 }
 0x149   : > { %v1020_v38 = vadd.f32 %v1019_v37, %v1006_v35  ;;  %1041 = sbr.rel (%p1575_p5) target bundleno = 348 (0x15c), region = 52 }
 0x14b   : > { %v1029_v39 = vadd.f32 %v1020_v38, %v257_v36 }
 0x14d   : > { %1037 = vst [vmem:[#allocation2 + $0x38] sm:$0xff] %v1029_v39 }
 0x14e   : > { %v1042_v40 = vld [vmem:[#allocation2 + $0x30] sm:$0xff]  ;;  %v1043_v42 = vld [vmem:[#allocation2] sm:$0xff]  ;;  %v1044_v45 = vld [vmem:[#allocation2 + $0x18] sm:$0xff] }
 0x14f   : > { %v1050_v41 = vld [vmem:[#allocation8] sm:$0xf]  ;;  %v1046_v49 = vld [vmem:[#allocation2 + $0x8] sm:$0xff]  ;;  %v1047_v53 = vld [vmem:[#allocation2 + $0x20] sm:$0xff] }
 0x150   : > { %v1052_v43 = vperm.slane %v1050_v41, 0  ;;  %v1053_v44 = vperm.slane %v1050_v41, 1  ;;  %v1054_v46 = vperm.slane %v1050_v41, 2  ;;  %v1045_v47 = vld [vmem:[#allocation2 + $0x10] sm:$0xff]  ;;  %v1055_v48 = vperm.slane %v1050_v41, 3  ;;  %v1048_v55 = vld [vmem:[#allocation2 + $0x28] sm:$0xff] }
 0x152   : > { %v1060_v50 = vadd.f32 %v1052_v43, %v1042_v40  ;;  %v1061_v51 = vadd.f32 %v1053_v44, %v1043_v42  ;;  %v1062_v52 = vadd.f32 %v1054_v46, %v1044_v45  ;;  %v1063_v54 = vadd.f32 %v1055_v48, %v1045_v47 }
 0x153   : > { %v1064_v56 = vadd.f32 %v1052_v43, %v1046_v49  ;;  %v1065_v58 = vadd.f32 %v1053_v44, %v1047_v53  ;;  %v1066_v60 = vadd.f32 %v1054_v46, %v1048_v55 }
 0x154   : > { %1068 = vst [vmem:[#allocation9] sm:$0xff] %v1060_v50  ;;  %v1049_v57 = vld [vmem:[#allocation2 + $0x38] sm:$0xff] }
 0x155   : > { %1069 = vst [vmem:[#allocation9 + $0x8] sm:$0xff] %v1061_v51  ;;  %v1067_v61 = vadd.f32 %v1055_v48, %v1049_v57 }
 0x156   : > { %1070 = vst [vmem:[#allocation9 + $0x10] sm:$0xff] %v1062_v52 }
 0x157   : > { %1071 = vst [vmem:[#allocation9 + $0x18] sm:$0xff] %v1063_v54 }
 0x158   : > { %1072 = vst [vmem:[#allocation9 + $0x20] sm:$0xff] %v1064_v56 }
 0x159   : > { %1073 = vst [vmem:[#allocation9 + $0x28] sm:$0xff] %v1065_v58 }
 0x15a   : > { %1074 = vst [vmem:[#allocation9 + $0x30] sm:$0xff] %v1066_v60 }
 0x15b   : > { %1075 = vst [vmem:[#allocation9 + $0x38] sm:$0xff] %v1067_v61 }
 0x15c PF: > { %p1713_p8 = scmp.eq.s32.totalorder %s1972_s16, 1  ;;  %s1930_s22 = smov [#allocation9]  }
 0x15d   : > { %s1081_s23 = sshll.u32 %s1930_s22, 4  ;;  %s1083_s24 = sshll.u32 %s2317_s3, 4  ;;  %s1082_s23 = int_to_ptr.vmem [resolvable:$true] %s1081_s23  ;;  %s1084_s24 = int_to_ptr.hbm [resolvable:$true] %s1083_s24 }
 0x15e   : > { %s1931_s25 = smov 512   ;;  %s1932_s26 = smov 32  }
 0x15f   : > { %1696 = dma.vmem_to_hbm [thread:$0]  (%p1713_p8), %s1082_s23, 1024, %s1084_s24, [#allocation5], %s1931_s25, %s1931_s25, %s1932_s26  }
 0x160   : > { %1904 = dma.done.wait (%p1713_p8), [#allocation5], 1024  }
 0x161   : > { %1906 = vsyncadd (%p1713_p8), [#allocation5], 4294966272 }
 0x162 PF: > { %p17_p9 = scmp.ge.s32.totalorder %s1975_s17, 4   ;;  %s2324_s12 = smov %s1913_s13 }
 0x163   : > { %s2325_s13 = smov %s1917_s14  ;;  %s2326_s14 = smov %s1985_s20 }
 0x164   : > { %s2327_s15 = smov %s1975_s17  ;;  %19 = sbr.rel (!%p17_p9) target bundleno = 8 (0x8), region = 94 }
 0x169   :  { %1100 = vsyncpa [#allocation4], 1 }
 0x16a   :  { %1102 = vsyncpa [#allocation4 + $0x1], 1 }
 0x16b   :  { %1103 = vsyncpa [#allocation7], 1 }
 0x16c   :  { %1105 = vsyncpa [#allocation7 + $0x1], 1 }
 0x16d   :  { %1106 = vsyncpa [#allocation5], 1 }
 0x16e   :  { %1108 = vsyncpa [#allocation5 + $0x1], 1 }

</bundles_post_ra>
